<compile_context>
chip_gen: v7x
topology: tpu7x:2x2x1
jax: 0.10.0
libtpu: 0.0.40
codegen_flags: <defaults>
</compile_context>

<pallas_src>
import jax
import jax.numpy as jnp
from jax.experimental import pallas as pl
from jax.experimental.pallas import tpu as pltpu


# ----------------------------------------------------------------------------
# Pallas kernel: fused 1x1-conv + separable bilinear resize (one batch / step)
# ----------------------------------------------------------------------------
def _finalscore_kernel(b_ref, w_ref, ah_ref, awt_ref, x_ref, o_ref, s_scr):
    # b_ref:   (1, 1)      f32  -- conv bias (interp rows sum to 1, so adding
    #                              it after the resize is exact)
    # w_ref:   (1, C)      f32  -- 1x1 conv weight
    # ah_ref:  (Ho, H)     f32  -- H-interp matrix
    # awt_ref: (W, Wo)     f32  -- W-interp matrix, transposed
    # x_ref:   (1, C, H*W) f32  -- f1[b] with spatial dims flattened (lane-dense)
    # s_scr:   (H, W)      f32  -- VMEM scratch for the un-flattened conv map
    Ho, H = ah_ref.shape
    W, Wo = awt_ref.shape

    xb = x_ref[0]                                                    # (C, H*W)
    # 1x1 conv == contraction over C (MXU, f32 accumulation).
    s = jnp.dot(w_ref[...], xb, preferred_element_type=jnp.float32)  # (1, H*W)

    # Un-flatten (1, H*W) -> (H, W): H static row stores into VMEM scratch.
    for h in range(H):
        s_scr[h, :] = s[0, h * W:(h + 1) * W]

    # Separable bilinear resize: Ah @ S @ Aw^T  (two small MXU matmuls).
    u = jnp.dot(ah_ref[...], s_scr[...],
                preferred_element_type=jnp.float32)                  # (Ho, W)
    out = jnp.dot(u, awt_ref[...],
                  preferred_element_type=jnp.float32)                # (Ho, Wo)
    o_ref[0] = out + b_ref[...]                                      # broadcast bias


def _interp_matrix(n_out, n_in):
    """Bilinear (align_corners=True) interpolation matrix (n_out, n_in)."""
    if n_in == 1:
        return jnp.ones((n_out, 1), jnp.float32)
    if n_out == 1:
        return jnp.zeros((1, n_in), jnp.float32).at[0, 0].set(1.0)
    pos = jnp.arange(n_out, dtype=jnp.float32) * (n_in - 1) / (n_out - 1)
    i0 = jnp.clip(jnp.floor(pos).astype(jnp.int32), 0, n_in - 2)
    frac = pos - i0.astype(jnp.float32)
    rows = jnp.arange(n_out)
    A = jnp.zeros((n_out, n_in), jnp.float32)
    A = A.at[rows, i0].add(1.0 - frac)
    A = A.at[rows, i0 + 1].add(frac)
    return A


def final_score_forward(params, f1, xsize):
    """f1: (B, 512, H, W) NCHW -> (B, 1, Ho, Wo) NCHW."""
    B, C, H, W = f1.shape
    Ho, Wo = xsize
    w_row = params["score_w"].reshape(1, C).astype(jnp.float32)
    bias = params["score_b"].reshape(1, 1).astype(jnp.float32)

    Ah = _interp_matrix(Ho, H)                    # (Ho, H)
    AwT = _interp_matrix(Wo, W).T                 # (W, Wo)

    x = f1.reshape(B, C, H * W).astype(jnp.float32)   # metadata-only view

    out = pl.pallas_call(
        _finalscore_kernel,
        out_shape=jax.ShapeDtypeStruct((B, Ho, Wo), jnp.float32),
        grid=(B,),
        in_specs=[
            pl.BlockSpec((1, 1), lambda b: (0, 0)),            # bias (resident)
            pl.BlockSpec((1, C), lambda b: (0, 0)),            # conv weight
            pl.BlockSpec((Ho, H), lambda b: (0, 0)),            # Ah
            pl.BlockSpec((W, Wo), lambda b: (0, 0)),            # Aw^T
            pl.BlockSpec((1, C, H * W), lambda b: (b, 0, 0)),    # f1[b]
        ],
        out_specs=pl.BlockSpec((1, Ho, Wo), lambda b: (b, 0, 0)),
        scratch_shapes=[pltpu.VMEM((H, W), jnp.float32)],
        compiler_params=pltpu.CompilerParams(
            dimension_semantics=("parallel",),                  # batches across TCs
        ),
    )(bias, w_row, Ah, AwT, x)
    return out.reshape(B, 1, Ho, Wo)


# ----------------------------------------------------------------------------
# Pure-JAX reference (f32) for a sanity check
# ----------------------------------------------------------------------------
def final_score_reference(params, f1, xsize):
    Ho, Wo = xsize
    _, _, H, W = f1.shape
    s = jnp.einsum("bchw,c->bhw", f1, params["score_w"]) + params["score_b"][0]
    Ah = _interp_matrix(Ho, H)
    Aw = _interp_matrix(Wo, W)
    out = jnp.einsum("oh,bhw,pw->bop", Ah, s, Aw)
    return out[:, None]                                         # (B, 1, Ho, Wo)


def init_final_score_params(key):
    kw, kb = jax.random.split(key)
    # nn.Conv2d(512, 1, 1, 1, 0): weight (1, 512, 1, 1), bias (1,)
    w = 0.05 * jax.random.normal(kw, (512,), jnp.float32)
    b = 0.05 * jax.random.normal(kb, (1,), jnp.float32)
    return {"score_w": w, "score_b": b}


# ----------------------------------------------------------------------------
if __name__ == "__main__":
    key = jax.random.PRNGKey(0)
    k1, kp = jax.random.split(key)

    B, C, H, W = 2, 512, 16, 16          # module fixes Cin = 512
    xsize = (128, 128)                   # lane-dense output (Wo = 128 lanes)

    f1 = jax.random.normal(k1, (B, C, H, W), jnp.float32)
    params = init_final_score_params(kp)

    fwd = jax.jit(final_score_forward, static_argnames=("xsize",))
    out = jax.block_until_ready(fwd(params, f1, xsize=xsize))

    assert out.shape == (B, 1, *xsize), out.shape
    assert bool(jnp.all(jnp.isfinite(out)))

    ref = final_score_reference(params, f1, xsize)
    max_err = float(jnp.max(jnp.abs(out - ref)))
    assert max_err < 1e-2, f"max abs err vs f32 reference: {max_err}"

    print("KERNEL_OK")
</pallas_src>

<mosaic_0001>
module attributes {stable_mosaic.version = 11 : i64} {
  func.func private @main(%arg0: i32) attributes {dimension_semantics = [#tpu.dimension_semantics<core_parallel>], iteration_bounds = array<i64: 2>, tpu.core_type = #tpu.core_type<sc_scalar_subcore>, window_params = []} {
    return
  }
}

module attributes {stable_mosaic.version = 11 : i64} {
  func.func private @main(%arg0: i32) attributes {dimension_semantics = [#tpu.dimension_semantics<core_parallel>], iteration_bounds = array<i64: 2>, tpu.core_type = #tpu.core_type<sc_scalar_subcore>, window_params = []} {
    return
  }
}

module attributes {stable_mosaic.version = 11 : i64} {
  func.func @_finalscore_kernel(%arg0: i32, %arg1: memref<1x1xf32, #tpu.memory_space<vmem>>, %arg2: memref<1x512xf32, #tpu.memory_space<vmem>>, %arg3: memref<128x16xf32, #tpu.memory_space<vmem>>, %arg4: memref<16x128xf32, #tpu.memory_space<vmem>>, %arg5: memref<1x512x256xf32, #tpu.memory_space<vmem>>, %arg6: memref<1x128x128xf32, #tpu.memory_space<vmem>>, %arg7: memref<16x16xf32, #tpu.memory_space<vmem>>) attributes {dimension_semantics = [#tpu.dimension_semantics<parallel>], iteration_bounds = array<i64: 2>, scalar_prefetch = 0 : i64, scratch_operands = 1 : i64, tpu.core_type = #tpu.core_type<tc>, window_params = [{pipeline_mode = #tpu.pipeline_mode<synchronous>, transform_indices = @transform_0, window_bounds = array<i64: 1, 1>}, {pipeline_mode = #tpu.pipeline_mode<synchronous>, transform_indices = @transform_1, window_bounds = array<i64: 1, 512>}, {pipeline_mode = #tpu.pipeline_mode<synchronous>, transform_indices = @transform_2, window_bounds = array<i64: 128, 16>}, {pipeline_mode = #tpu.pipeline_mode<synchronous>, transform_indices = @transform_3, window_bounds = array<i64: 16, 128>}, {transform_indices = @transform_4, window_bounds = array<i64: 1, 512, 256>}, {transform_indices = @transform_5, window_bounds = array<i64: 1, 128, 128>}]} {
    %c0 = arith.constant 0 : index
    %c0_0 = arith.constant 0 : index
    %c0_1 = arith.constant 0 : index
    %0 = vector.load %arg5[%c0, %c0_0, %c0_1] : memref<1x512x256xf32, #tpu.memory_space<vmem>>, vector<1x512x256xf32>
    %1 = vector.shape_cast %0 : vector<1x512x256xf32> to vector<512x256xf32>
    %c0_2 = arith.constant 0 : index
    %c0_3 = arith.constant 0 : index
    %2 = vector.load %arg2[%c0_2, %c0_3] : memref<1x512xf32, #tpu.memory_space<vmem>>, vector<1x512xf32>
    %cst = arith.constant dense<0.000000e+00> : vector<1x256xf32>
    %3 = tpu.matmul %2, %1, %cst {dimension_numbers = #tpu.dot_dimension_numbers<[1], [0], [0], [1], [0, 0, 1, 1], [], []>} : vector<1x512xf32>, vector<512x256xf32>, vector<1x256xf32> -> vector<1x256xf32>
    %4 = vector.extract_strided_slice %3 {offsets = [0, 0], sizes = [1, 16], strides = [1, 1]} : vector<1x256xf32> to vector<1x16xf32>
    %5 = vector.shape_cast %4 : vector<1x16xf32> to vector<16xf32>
    %c0_4 = arith.constant 0 : index
    %c0_5 = arith.constant 0 : index
    %6 = vector.load %arg7[%c0_4, %c0_5] : memref<16x16xf32, #tpu.memory_space<vmem>>, vector<1x16xf32>
    %7 = vector.shape_cast %6 : vector<1x16xf32> to vector<16xf32>
    %8 = vector.shape_cast %5 : vector<16xf32> to vector<1x16xf32>
    tpu.vector_store %arg7[%c0_4, %c0_5], %8 {strides = array<i32>} : memref<16x16xf32, #tpu.memory_space<vmem>>, vector<1x16xf32>,
    %9 = vector.extract_strided_slice %3 {offsets = [0, 16], sizes = [1, 16], strides = [1, 1]} : vector<1x256xf32> to vector<1x16xf32>
    %10 = vector.shape_cast %9 : vector<1x16xf32> to vector<16xf32>
    %c1 = arith.constant 1 : index
    %c0_6 = arith.constant 0 : index
    %11 = vector.load %arg7[%c1, %c0_6] : memref<16x16xf32, #tpu.memory_space<vmem>>, vector<1x16xf32>
    %12 = vector.shape_cast %11 : vector<1x16xf32> to vector<16xf32>
    %13 = vector.shape_cast %10 : vector<16xf32> to vector<1x16xf32>
    tpu.vector_store %arg7[%c1, %c0_6], %13 {strides = array<i32>} : memref<16x16xf32, #tpu.memory_space<vmem>>, vector<1x16xf32>,
    %14 = vector.extract_strided_slice %3 {offsets = [0, 32], sizes = [1, 16], strides = [1, 1]} : vector<1x256xf32> to vector<1x16xf32>
    %15 = vector.shape_cast %14 : vector<1x16xf32> to vector<16xf32>
    %c2 = arith.constant 2 : index
    %c0_7 = arith.constant 0 : index
    %16 = vector.load %arg7[%c2, %c0_7] : memref<16x16xf32, #tpu.memory_space<vmem>>, vector<1x16xf32>
    %17 = vector.shape_cast %16 : vector<1x16xf32> to vector<16xf32>
    %18 = vector.shape_cast %15 : vector<16xf32> to vector<1x16xf32>
    tpu.vector_store %arg7[%c2, %c0_7], %18 {strides = array<i32>} : memref<16x16xf32, #tpu.memory_space<vmem>>, vector<1x16xf32>,
    %19 = vector.extract_strided_slice %3 {offsets = [0, 48], sizes = [1, 16], strides = [1, 1]} : vector<1x256xf32> to vector<1x16xf32>
    %20 = vector.shape_cast %19 : vector<1x16xf32> to vector<16xf32>
    %c3 = arith.constant 3 : index
    %c0_8 = arith.constant 0 : index
    %21 = vector.load %arg7[%c3, %c0_8] : memref<16x16xf32, #tpu.memory_space<vmem>>, vector<1x16xf32>
    %22 = vector.shape_cast %21 : vector<1x16xf32> to vector<16xf32>
    %23 = vector.shape_cast %20 : vector<16xf32> to vector<1x16xf32>
    tpu.vector_store %arg7[%c3, %c0_8], %23 {strides = array<i32>} : memref<16x16xf32, #tpu.memory_space<vmem>>, vector<1x16xf32>,
    %24 = vector.extract_strided_slice %3 {offsets = [0, 64], sizes = [1, 16], strides = [1, 1]} : vector<1x256xf32> to vector<1x16xf32>
    %25 = vector.shape_cast %24 : vector<1x16xf32> to vector<16xf32>
    %c4 = arith.constant 4 : index
    %c0_9 = arith.constant 0 : index
    %26 = vector.load %arg7[%c4, %c0_9] : memref<16x16xf32, #tpu.memory_space<vmem>>, vector<1x16xf32>
    %27 = vector.shape_cast %26 : vector<1x16xf32> to vector<16xf32>
    %28 = vector.shape_cast %25 : vector<16xf32> to vector<1x16xf32>
    tpu.vector_store %arg7[%c4, %c0_9], %28 {strides = array<i32>} : memref<16x16xf32, #tpu.memory_space<vmem>>, vector<1x16xf32>,
    %29 = vector.extract_strided_slice %3 {offsets = [0, 80], sizes = [1, 16], strides = [1, 1]} : vector<1x256xf32> to vector<1x16xf32>
    %30 = vector.shape_cast %29 : vector<1x16xf32> to vector<16xf32>
    %c5 = arith.constant 5 : index
    %c0_10 = arith.constant 0 : index
    %31 = vector.load %arg7[%c5, %c0_10] : memref<16x16xf32, #tpu.memory_space<vmem>>, vector<1x16xf32>
    %32 = vector.shape_cast %31 : vector<1x16xf32> to vector<16xf32>
    %33 = vector.shape_cast %30 : vector<16xf32> to vector<1x16xf32>
    tpu.vector_store %arg7[%c5, %c0_10], %33 {strides = array<i32>} : memref<16x16xf32, #tpu.memory_space<vmem>>, vector<1x16xf32>,
    %34 = vector.extract_strided_slice %3 {offsets = [0, 96], sizes = [1, 16], strides = [1, 1]} : vector<1x256xf32> to vector<1x16xf32>
    %35 = vector.shape_cast %34 : vector<1x16xf32> to vector<16xf32>
    %c6 = arith.constant 6 : index
    %c0_11 = arith.constant 0 : index
    %36 = vector.load %arg7[%c6, %c0_11] : memref<16x16xf32, #tpu.memory_space<vmem>>, vector<1x16xf32>
    %37 = vector.shape_cast %36 : vector<1x16xf32> to vector<16xf32>
    %38 = vector.shape_cast %35 : vector<16xf32> to vector<1x16xf32>
    tpu.vector_store %arg7[%c6, %c0_11], %38 {strides = array<i32>} : memref<16x16xf32, #tpu.memory_space<vmem>>, vector<1x16xf32>,
    %39 = vector.extract_strided_slice %3 {offsets = [0, 112], sizes = [1, 16], strides = [1, 1]} : vector<1x256xf32> to vector<1x16xf32>
    %40 = vector.shape_cast %39 : vector<1x16xf32> to vector<16xf32>
    %c7 = arith.constant 7 : index
    %c0_12 = arith.constant 0 : index
    %41 = vector.load %arg7[%c7, %c0_12] : memref<16x16xf32, #tpu.memory_space<vmem>>, vector<1x16xf32>
    %42 = vector.shape_cast %41 : vector<1x16xf32> to vector<16xf32>
    %43 = vector.shape_cast %40 : vector<16xf32> to vector<1x16xf32>
    tpu.vector_store %arg7[%c7, %c0_12], %43 {strides = array<i32>} : memref<16x16xf32, #tpu.memory_space<vmem>>, vector<1x16xf32>,
    %44 = vector.extract_strided_slice %3 {offsets = [0, 128], sizes = [1, 16], strides = [1, 1]} : vector<1x256xf32> to vector<1x16xf32>
    %45 = vector.shape_cast %44 : vector<1x16xf32> to vector<16xf32>
    %c8 = arith.constant 8 : index
    %c0_13 = arith.constant 0 : index
    %46 = vector.load %arg7[%c8, %c0_13] : memref<16x16xf32, #tpu.memory_space<vmem>>, vector<1x16xf32>
    %47 = vector.shape_cast %46 : vector<1x16xf32> to vector<16xf32>
    %48 = vector.shape_cast %45 : vector<16xf32> to vector<1x16xf32>
    tpu.vector_store %arg7[%c8, %c0_13], %48 {strides = array<i32>} : memref<16x16xf32, #tpu.memory_space<vmem>>, vector<1x16xf32>,
    %49 = vector.extract_strided_slice %3 {offsets = [0, 144], sizes = [1, 16], strides = [1, 1]} : vector<1x256xf32> to vector<1x16xf32>
    %50 = vector.shape_cast %49 : vector<1x16xf32> to vector<16xf32>
    %c9 = arith.constant 9 : index
    %c0_14 = arith.constant 0 : index
    %51 = vector.load %arg7[%c9, %c0_14] : memref<16x16xf32, #tpu.memory_space<vmem>>, vector<1x16xf32>
    %52 = vector.shape_cast %51 : vector<1x16xf32> to vector<16xf32>
    %53 = vector.shape_cast %50 : vector<16xf32> to vector<1x16xf32>
    tpu.vector_store %arg7[%c9, %c0_14], %53 {strides = array<i32>} : memref<16x16xf32, #tpu.memory_space<vmem>>, vector<1x16xf32>,
    %54 = vector.extract_strided_slice %3 {offsets = [0, 160], sizes = [1, 16], strides = [1, 1]} : vector<1x256xf32> to vector<1x16xf32>
    %55 = vector.shape_cast %54 : vector<1x16xf32> to vector<16xf32>
    %c10 = arith.constant 10 : index
    %c0_15 = arith.constant 0 : index
    %56 = vector.load %arg7[%c10, %c0_15] : memref<16x16xf32, #tpu.memory_space<vmem>>, vector<1x16xf32>
    %57 = vector.shape_cast %56 : vector<1x16xf32> to vector<16xf32>
    %58 = vector.shape_cast %55 : vector<16xf32> to vector<1x16xf32>
    tpu.vector_store %arg7[%c10, %c0_15], %58 {strides = array<i32>} : memref<16x16xf32, #tpu.memory_space<vmem>>, vector<1x16xf32>,
    %59 = vector.extract_strided_slice %3 {offsets = [0, 176], sizes = [1, 16], strides = [1, 1]} : vector<1x256xf32> to vector<1x16xf32>
    %60 = vector.shape_cast %59 : vector<1x16xf32> to vector<16xf32>
    %c11 = arith.constant 11 : index
    %c0_16 = arith.constant 0 : index
    %61 = vector.load %arg7[%c11, %c0_16] : memref<16x16xf32, #tpu.memory_space<vmem>>, vector<1x16xf32>
    %62 = vector.shape_cast %61 : vector<1x16xf32> to vector<16xf32>
    %63 = vector.shape_cast %60 : vector<16xf32> to vector<1x16xf32>
    tpu.vector_store %arg7[%c11, %c0_16], %63 {strides = array<i32>} : memref<16x16xf32, #tpu.memory_space<vmem>>, vector<1x16xf32>,
    %64 = vector.extract_strided_slice %3 {offsets = [0, 192], sizes = [1, 16], strides = [1, 1]} : vector<1x256xf32> to vector<1x16xf32>
    %65 = vector.shape_cast %64 : vector<1x16xf32> to vector<16xf32>
    %c12 = arith.constant 12 : index
    %c0_17 = arith.constant 0 : index
    %66 = vector.load %arg7[%c12, %c0_17] : memref<16x16xf32, #tpu.memory_space<vmem>>, vector<1x16xf32>
    %67 = vector.shape_cast %66 : vector<1x16xf32> to vector<16xf32>
    %68 = vector.shape_cast %65 : vector<16xf32> to vector<1x16xf32>
    tpu.vector_store %arg7[%c12, %c0_17], %68 {strides = array<i32>} : memref<16x16xf32, #tpu.memory_space<vmem>>, vector<1x16xf32>,
    %69 = vector.extract_strided_slice %3 {offsets = [0, 208], sizes = [1, 16], strides = [1, 1]} : vector<1x256xf32> to vector<1x16xf32>
    %70 = vector.shape_cast %69 : vector<1x16xf32> to vector<16xf32>
    %c13 = arith.constant 13 : index
    %c0_18 = arith.constant 0 : index
    %71 = vector.load %arg7[%c13, %c0_18] : memref<16x16xf32, #tpu.memory_space<vmem>>, vector<1x16xf32>
    %72 = vector.shape_cast %71 : vector<1x16xf32> to vector<16xf32>
    %73 = vector.shape_cast %70 : vector<16xf32> to vector<1x16xf32>
    tpu.vector_store %arg7[%c13, %c0_18], %73 {strides = array<i32>} : memref<16x16xf32, #tpu.memory_space<vmem>>, vector<1x16xf32>,
    %74 = vector.extract_strided_slice %3 {offsets = [0, 224], sizes = [1, 16], strides = [1, 1]} : vector<1x256xf32> to vector<1x16xf32>
    %75 = vector.shape_cast %74 : vector<1x16xf32> to vector<16xf32>
    %c14 = arith.constant 14 : index
    %c0_19 = arith.constant 0 : index
    %76 = vector.load %arg7[%c14, %c0_19] : memref<16x16xf32, #tpu.memory_space<vmem>>, vector<1x16xf32>
    %77 = vector.shape_cast %76 : vector<1x16xf32> to vector<16xf32>
    %78 = vector.shape_cast %75 : vector<16xf32> to vector<1x16xf32>
    tpu.vector_store %arg7[%c14, %c0_19], %78 {strides = array<i32>} : memref<16x16xf32, #tpu.memory_space<vmem>>, vector<1x16xf32>,
    %79 = vector.extract_strided_slice %3 {offsets = [0, 240], sizes = [1, 16], strides = [1, 1]} : vector<1x256xf32> to vector<1x16xf32>
    %80 = vector.shape_cast %79 : vector<1x16xf32> to vector<16xf32>
    %c15 = arith.constant 15 : index
    %c0_20 = arith.constant 0 : index
    %81 = vector.load %arg7[%c15, %c0_20] : memref<16x16xf32, #tpu.memory_space<vmem>>, vector<1x16xf32>
    %82 = vector.shape_cast %81 : vector<1x16xf32> to vector<16xf32>
    %83 = vector.shape_cast %80 : vector<16xf32> to vector<1x16xf32>
    tpu.vector_store %arg7[%c15, %c0_20], %83 {strides = array<i32>} : memref<16x16xf32, #tpu.memory_space<vmem>>, vector<1x16xf32>,
    %c0_21 = arith.constant 0 : index
    %c0_22 = arith.constant 0 : index
    %84 = vector.load %arg3[%c0_21, %c0_22] : memref<128x16xf32, #tpu.memory_space<vmem>>, vector<128x16xf32>
    %c0_23 = arith.constant 0 : index
    %c0_24 = arith.constant 0 : index
    %85 = vector.load %arg7[%c0_23, %c0_24] : memref<16x16xf32, #tpu.memory_space<vmem>>, vector<16x16xf32>
    %cst_25 = arith.constant dense<0.000000e+00> : vector<128x16xf32>
    %86 = tpu.matmul %84, %85, %cst_25 {dimension_numbers = #tpu.dot_dimension_numbers<[1], [0], [0], [1], [0, 0, 1, 1], [], []>} : vector<128x16xf32>, vector<16x16xf32>, vector<128x16xf32> -> vector<128x16xf32>
    %c0_26 = arith.constant 0 : index
    %c0_27 = arith.constant 0 : index
    %87 = vector.load %arg4[%c0_26, %c0_27] : memref<16x128xf32, #tpu.memory_space<vmem>>, vector<16x128xf32>
    %cst_28 = arith.constant dense<0.000000e+00> : vector<128x128xf32>
    %88 = tpu.matmul %86, %87, %cst_28 {dimension_numbers = #tpu.dot_dimension_numbers<[1], [0], [0], [1], [0, 0, 1, 1], [], []>} : vector<128x16xf32>, vector<16x128xf32>, vector<128x128xf32> -> vector<128x128xf32>
    %c0_29 = arith.constant 0 : index
    %c0_30 = arith.constant 0 : index
    %89 = vector.load %arg1[%c0_29, %c0_30] : memref<1x1xf32, #tpu.memory_space<vmem>>, vector<1x1xf32>
    %90 = vector.broadcast %89 : vector<1x1xf32> to vector<128x128xf32>
    %91 = arith.addf %88, %90 : vector<128x128xf32>
    %c0_31 = arith.constant 0 : index
    %c0_32 = arith.constant 0 : index
    %c0_33 = arith.constant 0 : index
    %92 = vector.load %arg6[%c0_31, %c0_32, %c0_33] : memref<1x128x128xf32, #tpu.memory_space<vmem>>, vector<1x128x128xf32>
    %93 = vector.shape_cast %92 : vector<1x128x128xf32> to vector<128x128xf32>
    %94 = vector.shape_cast %91 : vector<128x128xf32> to vector<1x128x128xf32>
    tpu.vector_store %arg6[%c0_31, %c0_32, %c0_33], %94 {strides = array<i32>} : memref<1x128x128xf32, #tpu.memory_space<vmem>>, vector<1x128x128xf32>,
    return
  }
  func.func @transform_0(%arg0: i32) -> (i32, i32) {
    %c0_i32 = arith.constant 0 : i32
    %c0_i32_0 = arith.constant 0 : i32
    %c0_i32_1 = arith.constant 0 : i32
    return %c0_i32, %c0_i32_0 : i32, i32
  }
  func.func @transform_1(%arg0: i32) -> (i32, i32) {
    %c0_i32 = arith.constant 0 : i32
    %c0_i32_0 = arith.constant 0 : i32
    %c0_i32_1 = arith.constant 0 : i32
    return %c0_i32, %c0_i32_0 : i32, i32
  }
  func.func @transform_2(%arg0: i32) -> (i32, i32) {
    %c0_i32 = arith.constant 0 : i32
    %c0_i32_0 = arith.constant 0 : i32
    %c0_i32_1 = arith.constant 0 : i32
    return %c0_i32, %c0_i32_0 : i32, i32
  }
  func.func @transform_3(%arg0: i32) -> (i32, i32) {
    %c0_i32 = arith.constant 0 : i32
    %c0_i32_0 = arith.constant 0 : i32
    %c0_i32_1 = arith.constant 0 : i32
    return %c0_i32, %c0_i32_0 : i32, i32
  }
  func.func @transform_4(%arg0: i32) -> (i32, i32, i32) {
    %c0_i32 = arith.constant 0 : i32
    %c0_i32_0 = arith.constant 0 : i32
    %c0_i32_1 = arith.constant 0 : i32
    return %arg0, %c0_i32, %c0_i32_0 : i32, i32, i32
  }
  func.func @transform_5(%arg0: i32) -> (i32, i32, i32) {
    %c0_i32 = arith.constant 0 : i32
    %c0_i32_0 = arith.constant 0 : i32
    %c0_i32_1 = arith.constant 0 : i32
    return %arg0, %c0_i32, %c0_i32_0 : i32, i32, i32
  }
}

</mosaic_0001>

<bundles_post_ra>
// kernel: final_score_forward.1
= control target key start
LH: loop header
LB: loop body
LE: loop exit
PB: predicated region body
PF: predicated region fallthrough
CT: control target
= control target key end

     0   :  { %s1892_s0 = inlined_call_operand.<no memory space> [shape: f32[1,1], index: 0, kind: input, shape index: {}]   ;;  %s1893_s1 = inlined_call_operand.vmem [shape: f32[1,512], index: 1, kind: input, shape index: {}]   ;;  %s1894_s2 = inlined_call_operand.vmem [shape: f32[128,16], index: 2, kind: input, shape index: {}]   ;;  %s1895_s3 = inlined_call_operand.vmem [shape: f32[16,128], index: 3, kind: input, shape index: {}]   ;;  %s1896_s4 = inlined_call_operand.vmem [shape: f32[2,512,256], index: 4, kind: input, shape index: {}]   ;;  %s1897_s5 = inlined_call_operand.hbm [shape: f32[2,128,128], index: 5, kind: output, shape index: {}]  }
   0x1   :  { %v10_v0 = vstv %s1892_s0 }
   0x2   :  { %11 = vst [vmem:[#allocation3] sm:$0x1] %v10_v0 }
   0x3   :  { %12 = vsyncpa [#allocation5], 0 }
   0x4   :  { %14 = vsyncpa [#allocation5 + $0x1], 0  ;;  %s1522_s20 = smov 0   ;;  %s1524_s21 = smov 0  }
   0x5   :  { %s1526_s22 = smov 0   ;;  %s1528_s23 = smov 0  }
   0x6 LB: > { %s1543_s0 = sadd.s32 4294967295, %s1476_s23   ;;  %s1087_s24 = sadd.s32 4294967294, %s1476_s23   ;;  %s1476_s23 = sphi %s1528_s23, %s1903_s23   ;;  %s1472_s22 = sphi %s1526_s22, %s1902_s22   ;;  %s1468_s21 = sphi %s1524_s21, %s1901_s21   ;;  %s1464_s20 = sphi %s1522_s20, %s1900_s20  }
   0x7   : > { %s1547_s25 = sadd.s32 1, %s1476_s23   ;;  %s137_s26 = sadd.s32 1, %s1472_s22 }
   0x8   : > { %s134_s27 = ssub.s32 %s1476_s23, %s1547_s25  ;;  %p147_p0 = scmp.ne.s32.totalorder %s1472_s22, %s1468_s21 }
   0x9   : > { %p135_p1 = scmp.eq.s32.totalorder %s134_s27, 0  ;;  %p148_p2 = scmp.eq.s32.totalorder %s1543_s0, 1 }
   0xa   : > { %p153_p3 = scmp.ne.s32.totalorder %s1468_s21, %s1464_s20  ;;  %p154_p4 = scmp.eq.s32.totalorder %s1087_s24, 1 }
   0xb   : > { %s1558_s28 = scalar_select %p135_p1, %s1472_s22, %s137_s26  }
   0xc   : > { %p1560_p5 = por %p148_p2, %p147_p0  ;;  %p1564_p6 = por %p154_p4, %p153_p3 }
   0xd   : > { %p1090_p7 = scmp.ge.s32.totalorder %s1476_s23, 1  ;;  %p192_p8 = scmp.lt.s32.totalorder %s1476_s23, 3 }
   0xf   : > { %p193_p9 = pnand %p1090_p7, %p192_p8 }
  0x10   : > { %p220_p10 = scmp.lt.s32.totalorder (!%p193_p9), %s1543_s0, 1  ;;  %v355_v1 = vlaneseq (!%p193_p9)  ;;  %v353_v3 = vld [vmem:[%s1893_s1] sm:$0xf] (!%p193_p9)  ;;  %vm517_vm0 = vcmask (!%p193_p9), 122880   ;;  %s1478_s13 = smov (!%p193_p9), 80   ;;  %vm596_vm1 = vcmask (!%p193_p9), 130048  }
  0x11   : > { %196 = sbr.rel (%p193_p9) target bundleno = 996 (0x3e4), region = 40  ;;  %s1479_s14 = smov (!%p193_p9), 112  }
  0x12   : > { %v356_v2 = vshrl.u32 (!%p193_p9), %v355_v1, 7  ;;  %s1480_s15 = smov (!%p193_p9), 64   ;;  %s1481_s16 = smov (!%p193_p9), 96  }
  0x13   : > { %s1482_s17 = smov (!%p193_p9), 32   ;;  %s1483_s18 = smov (!%p193_p9), 48  }
  0x14   : > { %v361_v4 = vsub.s32 (!%p193_p9), 1, %v356_v2  ;;  %v357_v5 = vsub.s32 (!%p193_p9), 0, %v356_v2  ;;  %v369_v6 = vsub.s32 (!%p193_p9), 3, %v356_v2  ;;  %v365_v7 = vsub.s32 (!%p193_p9), 2, %v356_v2  ;;  %s1484_s19 = smov (!%p193_p9), 16   ;;  %s217_s27 = sand.u32 (!%p193_p9), 1, %s1468_s21  }
  0x15   : > { %s1133_s8 = sshll.u32 (!%p193_p9), %s1543_s0, 11 }
  0x16   : > { %v362_v11 = vrot.slane (!%p193_p9), %v353_v3, %v361_v4  ;;  %v1583_v12 = vrot.slane (!%p193_p9), %v353_v3, %v357_v5  ;;  %v1585_v13 = vrot.slane (!%p193_p9), %v353_v3, %v369_v6  ;;  %v1590_v18 = vrot.slane (!%p193_p9), %v353_v3, %v365_v7 }
  0x18   : > { %s221_s6 = scalar_select %p220_p10, %s1543_s0, 1  ;;  %439 = vmatprep.mubr.f32.mxu0 %v362_v11 }
  0x19   : > { %s1851_s0 = scalar_lea.sflag [#allocation5], %s217_s27 }
  0x1a   : > { %s1132_s9 = sshll.u32 %s221_s6, 10  ;;  %s1091_s6 = sshll.u32 %s217_s27, 7 }
  0x1b   : > { %s1578_s12 = scalar_lea.vmem %s1896_s4, %s1132_s9  ;;  %s1822_s7 = scalar_lea.vmem [#allocation4], %s1091_s6 }
  0x1c   : > { %v226_v8 = vld [vmem:[%s1578_s12 + $0x8] sm:$0xff]  ;;  %v228_v9 = vld [vmem:[%s1578_s12 + $0x18] sm:$0xff]  ;;  %v225_v10 = vld [vmem:[%s1578_s12] sm:$0xff]  ;;  %s1025_s9 = sshll.u32 %s1822_s7, 4  ;;  %s1845_s9 = int_to_ptr.vmem [resolvable:$true] %s1025_s9 }
  0x1d   : > { %v1226_v14 = vpack.c.bf16 %v228_v9, %v226_v8  ;;  %v227_v15 = vld [vmem:[%s1578_s12 + $0x10] sm:$0xff]  ;;  %v230_v16 = vld [vmem:[%s1578_s12 + $0x28] sm:$0xff]  ;;  %v232_v17 = vld [vmem:[%s1578_s12 + $0x38] sm:$0xff] }
  0x1e   : > { %v1228_v19 = vpack.c.bf16 %v227_v15, %v225_v10  ;;  %v1230_v20 = vpack.c.bf16 %v232_v17, %v230_v16  ;;  %v229_v21 = vld [vmem:[%s1578_s12 + $0x20] sm:$0xff]  ;;  %v231_v22 = vld [vmem:[%s1578_s12 + $0x30] sm:$0xff]  ;;  %v234_v23 = vld [vmem:[%s1578_s12 + $0x48] sm:$0xff] }
  0x1f   : > { %1227 = vmatprep.subr.bf16.mxu0 %v1226_v14  ;;  %v236_v24 = vld [vmem:[%s1578_s12 + $0x58] sm:$0xff]  ;;  %v1232_v25 = vpack.c.bf16 %v231_v22, %v229_v21  ;;  %v233_v27 = vld [vmem:[%s1578_s12 + $0x40] sm:$0xff]  ;;  %v235_v28 = vld [vmem:[%s1578_s12 + $0x50] sm:$0xff] }
  0x20   : > { %1229 = vmatpush1.bf16.msra.mxu0 %v1228_v19  ;;  %v1234_v26 = vpack.c.bf16 %v236_v24, %v234_v23  ;;  %v238_v29 = vld [vmem:[%s1578_s12 + $0x68] sm:$0xff]  ;;  %v240_v30 = vld [vmem:[%s1578_s12 + $0x78] sm:$0xff]  ;;  %v1236_v31 = vpack.c.bf16 %v235_v28, %v233_v27  ;;  %v237_v33 = vld [vmem:[%s1578_s12 + $0x60] sm:$0xff] }
  0x21   : > { %1231 = vmatprep.subr.bf16.mxu0 %v1230_v20  ;;  %v1238_v32 = vpack.c.bf16 %v240_v30, %v238_v29  ;;  %v239_v34 = vld [vmem:[%s1578_s12 + $0x70] sm:$0xff]  ;;  %v242_v35 = vld [vmem:[%s1578_s12 + $0x88] sm:$0xff]  ;;  %v244_v36 = vld [vmem:[%s1578_s12 + $0x98] sm:$0xff] }
  0x22   : > { %v1240_v37 = vpack.c.bf16 %v239_v34, %v237_v33  ;;  %v1242_v38 = vpack.c.bf16 %v244_v36, %v242_v35  ;;  %v241_v39 = vld [vmem:[%s1578_s12 + $0x80] sm:$0xff]  ;;  %v243_v40 = vld [vmem:[%s1578_s12 + $0x90] sm:$0xff]  ;;  %v246_v41 = vld [vmem:[%s1578_s12 + $0xa8] sm:$0xff] }
  0x23   : > { %v248_v42 = vld [vmem:[%s1578_s12 + $0xb8] sm:$0xff]  ;;  %v1244_v43 = vpack.c.bf16 %v243_v40, %v241_v39  ;;  %v245_v45 = vld [vmem:[%s1578_s12 + $0xa0] sm:$0xff]  ;;  %v247_v46 = vld [vmem:[%s1578_s12 + $0xb0] sm:$0xff] }
  0x24   : > { %1233 = vmatpush1.bf16.msra.mxu0 %v1232_v25  ;;  %v1246_v44 = vpack.c.bf16 %v248_v42, %v246_v41  ;;  %v250_v47 = vld [vmem:[%s1578_s12 + $0xc8] sm:$0xff]  ;;  %v252_v48 = vld [vmem:[%s1578_s12 + $0xd8] sm:$0xff]  ;;  %v1248_v49 = vpack.c.bf16 %v247_v46, %v245_v45  ;;  %v249_v51 = vld [vmem:[%s1578_s12 + $0xc0] sm:$0xff] }
  0x25   : > { %1235 = vmatprep.subr.bf16.mxu0 %v1234_v26  ;;  %v1250_v50 = vpack.c.bf16 %v252_v48, %v250_v47  ;;  %v251_v52 = vld [vmem:[%s1578_s12 + $0xd0] sm:$0xff]  ;;  %v254_v53 = vld [vmem:[%s1578_s12 + $0xe8] sm:$0xff]  ;;  %v256_v54 = vld [vmem:[%s1578_s12 + $0xf8] sm:$0xff] }
  0x26   : > { %v1252_v55 = vpack.c.bf16 %v251_v52, %v249_v51  ;;  %v1254_v56 = vpack.c.bf16 %v256_v54, %v254_v53  ;;  %v253_v57 = vld [vmem:[%s1578_s12 + $0xe0] sm:$0xff]  ;;  %v255_v58 = vld [vmem:[%s1578_s12 + $0xf0] sm:$0xff]  ;;  %v258_v59 = vld [vmem:[%s1578_s12 + $0x108] sm:$0xff] }
  0x27   : > { %v260_v60 = vld [vmem:[%s1578_s12 + $0x118] sm:$0xff]  ;;  %v1256_v61 = vpack.c.bf16 %v255_v58, %v253_v57  ;;  %v257_v63 = vld [vmem:[%s1578_s12 + $0x100] sm:$0xff]  ;;  %v259_v0 = vld [vmem:[%s1578_s12 + $0x110] sm:$0xff] }
  0x28   : > { %1237 = vmatpush1.bf16.msra.mxu0 %v1236_v31  ;;  %v1258_v62 = vpack.c.bf16 %v260_v60, %v258_v59  ;;  %v262_v1 = vld [vmem:[%s1578_s12 + $0x128] sm:$0xff]  ;;  %v264_v2 = vld [vmem:[%s1578_s12 + $0x138] sm:$0xff]  ;;  %v1260_v3 = vpack.c.bf16 %v259_v0, %v257_v63  ;;  %v261_v5 = vld [vmem:[%s1578_s12 + $0x120] sm:$0xff] }
  0x29   : > { %1239 = vmatprep.subr.bf16.mxu0 %v1238_v32  ;;  %v1262_v4 = vpack.c.bf16 %v264_v2, %v262_v1  ;;  %v263_v6 = vld [vmem:[%s1578_s12 + $0x130] sm:$0xff]  ;;  %v266_v7 = vld [vmem:[%s1578_s12 + $0x148] sm:$0xff]  ;;  %v268_v8 = vld [vmem:[%s1578_s12 + $0x158] sm:$0xff] }
  0x2a   : > { %v1264_v9 = vpack.c.bf16 %v263_v6, %v261_v5  ;;  %v1266_v10 = vpack.c.bf16 %v268_v8, %v266_v7  ;;  %v265_v11 = vld [vmem:[%s1578_s12 + $0x140] sm:$0xff]  ;;  %v267_v14 = vld [vmem:[%s1578_s12 + $0x150] sm:$0xff]  ;;  %v270_v15 = vld [vmem:[%s1578_s12 + $0x168] sm:$0xff] }
  0x2b   : > { %v272_v16 = vld [vmem:[%s1578_s12 + $0x178] sm:$0xff]  ;;  %v1268_v17 = vpack.c.bf16 %v267_v14, %v265_v11  ;;  %v269_v20 = vld [vmem:[%s1578_s12 + $0x160] sm:$0xff]  ;;  %v271_v21 = vld [vmem:[%s1578_s12 + $0x170] sm:$0xff] }
  0x2c   : > { %1241 = vmatpush1.bf16.msra.mxu0 %v1240_v37  ;;  %v1270_v19 = vpack.c.bf16 %v272_v16, %v270_v15  ;;  %v274_v22 = vld [vmem:[%s1578_s12 + $0x188] sm:$0xff]  ;;  %v276_v23 = vld [vmem:[%s1578_s12 + $0x198] sm:$0xff]  ;;  %v1272_v24 = vpack.c.bf16 %v271_v21, %v269_v20  ;;  %v273_v26 = vld [vmem:[%s1578_s12 + $0x180] sm:$0xff] }
  0x2d   : > { %1243 = vmatprep.subr.bf16.mxu0 %v1242_v38  ;;  %v1274_v25 = vpack.c.bf16 %v276_v23, %v274_v22  ;;  %v275_v27 = vld [vmem:[%s1578_s12 + $0x190] sm:$0xff]  ;;  %v278_v28 = vld [vmem:[%s1578_s12 + $0x1a8] sm:$0xff]  ;;  %v280_v29 = vld [vmem:[%s1578_s12 + $0x1b8] sm:$0xff] }
  0x2e   : > { %v1276_v30 = vpack.c.bf16 %v275_v27, %v273_v26  ;;  %v1278_v31 = vpack.c.bf16 %v280_v29, %v278_v28  ;;  %v277_v32 = vld [vmem:[%s1578_s12 + $0x1a0] sm:$0xff]  ;;  %v279_v33 = vld [vmem:[%s1578_s12 + $0x1b0] sm:$0xff]  ;;  %v282_v34 = vld [vmem:[%s1578_s12 + $0x1c8] sm:$0xff] }
  0x2f   : > { %v284_v35 = vld [vmem:[%s1578_s12 + $0x1d8] sm:$0xff]  ;;  %v1280_v36 = vpack.c.bf16 %v279_v33, %v277_v32  ;;  %v281_v38 = vld [vmem:[%s1578_s12 + $0x1c0] sm:$0xff]  ;;  %v283_v39 = vld [vmem:[%s1578_s12 + $0x1d0] sm:$0xff] }
  0x30   : > { %1245 = vmatpush1.bf16.msra.mxu0 %v1244_v43  ;;  %v1282_v37 = vpack.c.bf16 %v284_v35, %v282_v34  ;;  %v286_v40 = vld [vmem:[%s1578_s12 + $0x1e8] sm:$0xff]  ;;  %v288_v41 = vld [vmem:[%s1578_s12 + $0x1f8] sm:$0xff]  ;;  %v1284_v42 = vpack.c.bf16 %v283_v39, %v281_v38  ;;  %v287_v45 = vld [vmem:[%s1578_s12 + $0x1f0] sm:$0xff] }
  0x31   : > { %1247 = vmatprep.subr.bf16.mxu0 %v1246_v44  ;;  %v1286_v43 = vpack.c.bf16 %v288_v41, %v286_v40  ;;  %v285_v44 = vld [vmem:[%s1578_s12 + $0x1e0] sm:$0xff]  ;;  %v290_v46 = vld [vmem:[%s1578_s12 + $0x208] sm:$0xff]  ;;  %v292_v47 = vld [vmem:[%s1578_s12 + $0x218] sm:$0xff] }
  0x32   : > { %v1288_v48 = vpack.c.bf16 %v287_v45, %v285_v44  ;;  %v291_v51 = vld [vmem:[%s1578_s12 + $0x210] sm:$0xff]  ;;  %v294_v52 = vld [vmem:[%s1578_s12 + $0x228] sm:$0xff]  ;;  %v296_v53 = vld [vmem:[%s1578_s12 + $0x238] sm:$0xff] }
  0x33   : > { %v295_v57 = vld [vmem:[%s1578_s12 + $0x230] sm:$0xff]  ;;  %v298_v58 = vld [vmem:[%s1578_s12 + $0x248] sm:$0xff]  ;;  %v300_v59 = vld [vmem:[%s1578_s12 + $0x258] sm:$0xff] }
  0x34   : > { %1249 = vmatpush1.bf16.msra.mxu0 %v1248_v49  ;;  %v1290_v49 = vpack.c.bf16 %v292_v47, %v290_v46  ;;  %v299_v63 = vld [vmem:[%s1578_s12 + $0x250] sm:$0xff]  ;;  %v302_v0 = vld [vmem:[%s1578_s12 + $0x268] sm:$0xff]  ;;  %v304_v1 = vld [vmem:[%s1578_s12 + $0x278] sm:$0xff] }
  0x35   : > { %1251 = vmatprep.subr.bf16.mxu0 %v1250_v50  ;;  %v289_v50 = vld [vmem:[%s1578_s12 + $0x200] sm:$0xff]  ;;  %v306_v5 = vld [vmem:[%s1578_s12 + $0x288] sm:$0xff]  ;;  %v312_v11 = vld [vmem:[%s1578_s12 + $0x2b8] sm:$0xff] }
  0x36   : > { %v1292_v54 = vpack.c.bf16 %v291_v51, %v289_v50  ;;  %v305_v8 = vld [vmem:[%s1578_s12 + $0x280] sm:$0xff]  ;;  %v316_v20 = vld [vmem:[%s1578_s12 + $0x2d8] sm:$0xff] }
  0x37   : > { %v309_v16 = vld [vmem:[%s1578_s12 + $0x2a0] sm:$0xff]  ;;  %v320_v26 = vld [vmem:[%s1578_s12 + $0x2f8] sm:$0xff] }
  0x38   : > { %1253 = vmatpush1.bf16.msra.mxu0 %v1252_v55  ;;  %v1294_v55 = vpack.c.bf16 %v296_v53, %v294_v52  ;;  %v313_v23 = vld [vmem:[%s1578_s12 + $0x2c0] sm:$0xff]  ;;  %v324_v32 = vld [vmem:[%s1578_s12 + $0x318] sm:$0xff] }
  0x39   : > { %1255 = vmatprep.subr.bf16.mxu0 %v1254_v56  ;;  %v293_v56 = vld [vmem:[%s1578_s12 + $0x220] sm:$0xff]  ;;  %v328_v38 = vld [vmem:[%s1578_s12 + $0x338] sm:$0xff] }
  0x3a   : > { %v1296_v60 = vpack.c.bf16 %v295_v57, %v293_v56  ;;  %v317_v29 = vld [vmem:[%s1578_s12 + $0x2e0] sm:$0xff]  ;;  %v332_v44 = vld [vmem:[%s1578_s12 + $0x358] sm:$0xff] }
  0x3b   : > { %v321_v35 = vld [vmem:[%s1578_s12 + $0x300] sm:$0xff]  ;;  %v336_v50 = vld [vmem:[%s1578_s12 + $0x378] sm:$0xff] }
  0x3c   : > { %1257 = vmatpush1.bf16.msra.mxu0 %v1256_v61  ;;  %v1298_v61 = vpack.c.bf16 %v300_v59, %v298_v58  ;;  %v325_v41 = vld [vmem:[%s1578_s12 + $0x320] sm:$0xff]  ;;  %v340_v56 = vld [vmem:[%s1578_s12 + $0x398] sm:$0xff] }
  0x3d   : > { %1259 = vmatprep.subr.bf16.mxu0 %v1258_v62  ;;  %v297_v62 = vld [vmem:[%s1578_s12 + $0x240] sm:$0xff] }
  0x3e   : > { %v1300_v2 = vpack.c.bf16 %v299_v63, %v297_v62  ;;  %v329_v47 = vld [vmem:[%s1578_s12 + $0x340] sm:$0xff]  ;;  %v344_v62 = vld [vmem:[%s1578_s12 + $0x3b8] sm:$0xff] }
  0x3f   : > { %v333_v53 = vld [vmem:[%s1578_s12 + $0x360] sm:$0xff] }
  0x40   : > { %1261 = vmatpush1.bf16.msra.mxu0 %v1260_v3  ;;  %v301_v3 = vld [vmem:[%s1578_s12 + $0x260] sm:$0xff] }
  0x41   : > { %1263 = vmatprep.subr.bf16.mxu0 %v1262_v4  ;;  %v303_v4 = vld [vmem:[%s1578_s12 + $0x270] sm:$0xff]  ;;  %v337_v59 = vld [vmem:[%s1578_s12 + $0x380] sm:$0xff] }
  0x42   : > { %v1304_v6 = vpack.c.bf16 %v303_v4, %v301_v3  ;;  %v348_v3 = vld [vmem:[%s1578_s12 + $0x3d8] sm:$0xff] }
  0x44   : > { %1265 = vmatpush1.bf16.msra.mxu0 %v1264_v9  ;;  %v307_v9 = vld [vmem:[%s1578_s12 + $0x290] sm:$0xff] }
  0x45   : > { %1267 = vmatprep.subr.bf16.mxu0 %v1266_v10  ;;  %v310_v10 = vld [vmem:[%s1578_s12 + $0x2a8] sm:$0xff]  ;;  %v1308_v14 = vpack.c.bf16 %v307_v9, %v305_v8  ;;  %v352_v8 = vld [vmem:[%s1578_s12 + $0x3f8] sm:$0xff] }
  0x46   : > { %v1310_v15 = vpack.c.bf16 %v312_v11, %v310_v10  ;;  %v349_v11 = vld [vmem:[%s1578_s12 + $0x3e0] sm:$0xff] }
  0x48   : > { %1269 = vmatpush1.bf16.msra.mxu0 %v1268_v17  ;;  %v311_v17 = vld [vmem:[%s1578_s12 + $0x2b0] sm:$0xff] }
  0x49   : > { %1271 = vmatprep.subr.bf16.mxu0 %v1270_v19  ;;  %v314_v19 = vld [vmem:[%s1578_s12 + $0x2c8] sm:$0xff]  ;;  %v1312_v21 = vpack.c.bf16 %v311_v17, %v309_v16 }
  0x4a   : > { %v1314_v22 = vpack.c.bf16 %v316_v20, %v314_v19 }
  0x4c   : > { %1273 = vmatpush1.bf16.msra.mxu0 %v1272_v24  ;;  %v315_v24 = vld [vmem:[%s1578_s12 + $0x2d0] sm:$0xff] }
  0x4d   : > { %1275 = vmatprep.subr.bf16.mxu0 %v1274_v25  ;;  %v318_v25 = vld [vmem:[%s1578_s12 + $0x2e8] sm:$0xff]  ;;  %v1316_v27 = vpack.c.bf16 %v315_v24, %v313_v23 }
  0x4e   : > { %v1318_v28 = vpack.c.bf16 %v320_v26, %v318_v25 }
  0x50   : > { %1277 = vmatpush1.bf16.msra.mxu0 %v1276_v30  ;;  %v319_v30 = vld [vmem:[%s1578_s12 + $0x2f0] sm:$0xff] }
  0x51   : > { %1279 = vmatprep.subr.bf16.mxu0 %v1278_v31  ;;  %v322_v31 = vld [vmem:[%s1578_s12 + $0x308] sm:$0xff]  ;;  %v1320_v33 = vpack.c.bf16 %v319_v30, %v317_v29 }
  0x52   : > { %v1322_v34 = vpack.c.bf16 %v324_v32, %v322_v31 }
  0x54   : > { %1281 = vmatpush1.bf16.msra.mxu0 %v1280_v36  ;;  %v323_v36 = vld [vmem:[%s1578_s12 + $0x310] sm:$0xff] }
  0x55   : > { %1283 = vmatprep.subr.bf16.mxu0 %v1282_v37  ;;  %v326_v37 = vld [vmem:[%s1578_s12 + $0x328] sm:$0xff]  ;;  %v1324_v39 = vpack.c.bf16 %v323_v36, %v321_v35 }
  0x56   : > { %v1326_v40 = vpack.c.bf16 %v328_v38, %v326_v37 }
  0x58   : > { %1285 = vmatpush1.bf16.msra.mxu0 %v1284_v42  ;;  %v327_v42 = vld [vmem:[%s1578_s12 + $0x330] sm:$0xff] }
  0x59   : > { %1287 = vmatprep.subr.bf16.mxu0 %v1286_v43  ;;  %v330_v43 = vld [vmem:[%s1578_s12 + $0x348] sm:$0xff]  ;;  %v1328_v45 = vpack.c.bf16 %v327_v42, %v325_v41  ;;  %v581_v41 = vld [vmem:[%s1894_s2 + $0x18] sm:$0xff]  ;;  %v582_v42 = vld [vmem:[%s1894_s2 + $0x20] sm:$0xff] }
  0x5a   : > { %v1330_v46 = vpack.c.bf16 %v332_v44, %v330_v43  ;;  %v583_v43 = vld [vmem:[%s1894_s2 + $0x28] sm:$0xff]  ;;  %v584_v44 = vld [vmem:[%s1894_s2 + $0x30] sm:$0xff] }
  0x5c   : > { %1289 = vmatpush1.bf16.msra.mxu0 %v1288_v48  ;;  %v331_v48 = vld [vmem:[%s1578_s12 + $0x350] sm:$0xff] }
  0x5d   : > { %1291 = vmatprep.subr.bf16.mxu0 %v1290_v49  ;;  %v334_v49 = vld [vmem:[%s1578_s12 + $0x368] sm:$0xff]  ;;  %v1332_v51 = vpack.c.bf16 %v331_v48, %v329_v47  ;;  %v588_v48 = vld [vmem:[%s1894_s2 + $0x50] sm:$0xff] }
  0x5e   : > { %v1334_v52 = vpack.c.bf16 %v336_v50, %v334_v49  ;;  %v587_v47 = vld [vmem:[%s1894_s2 + $0x48] sm:$0xff]  ;;  %v589_v49 = vld [vmem:[%s1894_s2 + $0x58] sm:$0xff]  ;;  %v590_v50 = vld [vmem:[%s1894_s2 + $0x60] sm:$0xff] }
  0x5f   : > { %440 = vmatmul.mubr.f32.vlgmr.msra.gmra.mrb[0].mxu0 %v1583_v12  ;;  %v1302_v12 = vpack.c.bf16 %v304_v1, %v302_v0  ;;  %v341_v1 = vld [vmem:[%s1578_s12 + $0x3a0] sm:$0xff] }
  0x60   : > { %1293 = vmatpush1.bf16.msra.mxu0 %v1292_v54  ;;  %510 = vmatprep.mubr.f32.mxu0 %v1585_v13  ;;  %v308_v13 = vld [vmem:[%s1578_s12 + $0x298] sm:$0xff]  ;;  %v335_v54 = vld [vmem:[%s1578_s12 + $0x370] sm:$0xff] }
  0x61   : > { %1295 = vmatprep.subr.bf16.mxu0 %v1294_v55  ;;  %v1306_v7 = vpack.c.bf16 %v308_v13, %v306_v5  ;;  %v338_v55 = vld [vmem:[%s1578_s12 + $0x388] sm:$0xff]  ;;  %v1336_v57 = vpack.c.bf16 %v335_v54, %v333_v53  ;;  %v345_v13 = vld [vmem:[%s1578_s12 + $0x3c0] sm:$0xff]  ;;  %v593_v53 = vld [vmem:[%s1894_s2 + $0x78] sm:$0xff] }
  0x62   : > { %v1338_v58 = vpack.c.bf16 %v340_v56, %v338_v55  ;;  %v1110_v54 = vld [vmem:[#allocation3] ss:$0 sm:$0xff]  ;;  %v1485_v55 = vmov 0  }
  0x63   : > { %1413 = vset.pattern.permute.xlu0 %v1485_v55 }
  0x64   : > { %1297 = vmatpush1.bf16.msra.mxu0 %v1296_v60  ;;  %v339_v60 = vld [vmem:[%s1578_s12 + $0x390] sm:$0xff] }
  0x65   : > { %1299 = vmatprep.subr.bf16.mxu0 %v1298_v61  ;;  %v342_v61 = vld [vmem:[%s1578_s12 + $0x3a8] sm:$0xff]  ;;  %v1340_v63 = vpack.c.bf16 %v339_v60, %v337_v59 }
  0x66   : > { %v1342_v0 = vpack.c.bf16 %v344_v62, %v342_v61 }
  0x68   : > { %1301 = vmatpush1.bf16.msra.mxu0 %v1300_v2  ;;  %v343_v2 = vld [vmem:[%s1578_s12 + $0x3b0] sm:$0xff] }
  0x69   : > { %1303 = vmatprep.subr.bf16.mxu0 %v1302_v12  ;;  %v346_v12 = vld [vmem:[%s1578_s12 + $0x3c8] sm:$0xff]  ;;  %v1344_v4 = vpack.c.bf16 %v343_v2, %v341_v1 }
  0x6a   : > { %v1346_v5 = vpack.c.bf16 %v348_v3, %v346_v12 }
  0x6c   : > { %1305 = vmatpush1.bf16.msra.mxu0 %v1304_v6  ;;  %v347_v6 = vld [vmem:[%s1578_s12 + $0x3d0] sm:$0xff] }
  0x6d   : > { %1307 = vmatprep.subr.bf16.mxu0 %v1306_v7  ;;  %v350_v7 = vld [vmem:[%s1578_s12 + $0x3e8] sm:$0xff]  ;;  %v1348_v9 = vpack.c.bf16 %v347_v6, %v345_v13 }
  0x6e   : > { %v1350_v10 = vpack.c.bf16 %v352_v8, %v350_v7 }
  0x70   : > { %1309 = vmatpush1.bf16.msra.mxu0 %v1308_v14  ;;  %v351_v14 = vld [vmem:[%s1578_s12 + $0x3f0] sm:$0xff]  ;;  %s1843_s12 = scalar_lea.hbm %s1897_s5, %s1133_s8 }
  0x71   : > { %1311 = vmatprep.subr.bf16.mxu0 %v1310_v15  ;;  %v1352_v15 = vpack.c.bf16 %v351_v14, %v349_v11 }
  0x74   : > { %1313 = vmatpush1.bf16.msra.mxu0 %v1312_v21 }
  0x75   : > { %1315 = vmatprep.subr.bf16.mxu0 %v1314_v22 }
  0x78   : > { %1317 = vmatpush1.bf16.msra.mxu0 %v1316_v27 }
  0x79   : > { %1319 = vmatprep.subr.bf16.mxu0 %v1318_v28 }
  0x7c   : > { %1321 = vmatpush1.bf16.msra.mxu0 %v1320_v33  ;;  %v790_v33 = vld [vmem:[%s1895_s3] sm:$0xff] }
  0x7d   : > { %1323 = vmatprep.subr.bf16.mxu0 %v1322_v34  ;;  %v791_v34 = vld [vmem:[%s1895_s3 + $0x8] sm:$0xff] }
  0x7e   : > { %v1358_v38 = vpack.c.bf16 %v791_v34, %v790_v33 }
  0x80   : > { %1325 = vmatpush1.bf16.msra.mxu0 %v1324_v39  ;;  %v579_v39 = vld [vmem:[%s1894_s2 + $0x8] sm:$0xff] }
  0x81   : > { %1327 = vmatprep.subr.bf16.mxu0 %v1326_v40  ;;  %v580_v40 = vld [vmem:[%s1894_s2 + $0x10] sm:$0xff] }
  0x84   : > { %1329 = vmatpush1.bf16.msra.mxu0 %v1328_v45  ;;  %v585_v45 = vld [vmem:[%s1894_s2 + $0x38] sm:$0xff] }
  0x85   : > { %1331 = vmatprep.subr.bf16.mxu0 %v1330_v46  ;;  %v586_v46 = vld [vmem:[%s1894_s2 + $0x40] sm:$0xff] }
  0x88   : > { %1333 = vmatpush1.bf16.msra.mxu0 %v1332_v51  ;;  %v591_v51 = vld [vmem:[%s1894_s2 + $0x68] sm:$0xff] }
  0x89   : > { %1335 = vmatprep.subr.bf16.mxu0 %v1334_v52  ;;  %v592_v52 = vld [vmem:[%s1894_s2 + $0x70] sm:$0xff] }
  0x8c   : > { %1337 = vmatpush1.bf16.msra.mxu0 %v1336_v57 }
  0x8d   : > { %1339 = vmatprep.subr.bf16.mxu0 %v1338_v58 }
  0x90   : > { %1341 = vmatpush1.bf16.msra.mxu0 %v1340_v63 }
  0x91   : > { %1343 = vmatprep.subr.bf16.mxu0 %v1342_v0 }
  0x94   : > { %1345 = vmatpush1.bf16.msra.mxu0 %v1344_v4 }
  0x95   : > { %1347 = vmatprep.subr.bf16.mxu0 %v1346_v5 }
  0x98   : > { %1349 = vmatpush1.bf16.msra.mxu0 %v1348_v9 }
  0x99   : > { %1351 = vmatprep.subr.bf16.mxu0 %v1350_v10 }
  0x9c   : > { %1353 = vmatpush1.bf16.msra.mxu0 %v1352_v15 }
  0x9f   : > { %511 = vmatmul.mubr.f32.vlgmr.msra.gmra.mrb[0].mxu0 %v1590_v18  ;;  %v578_v18 = vld [vmem:[%s1894_s2] sm:$0xff] }
  0xa0   : > { %1174 = vmatprep.mubr.msk.f32.mxu1 %vm596_vm1, %v578_v18 }
 0x172   : > { %v512_v16 = vpop.f32.mrb[0].mxu0 }
 0x173   : > { %518 = vst.msk [vmem:[#allocation2] sm:$0x1] %vm517_vm0, %v512_v16  ;;  %528 = vrot.lane.b32.xlu1 %v512_v16, %s1478_s13  ;;  %520 = vrot.lane.b32.xlu0 %v512_v16, %s1479_s14  ;;  %v514_v17 = vpop.f32.mrb[1].mxu0 }
 0x174   : > { %548 = vst.msk [vmem:[#allocation2 + $0x8] sm:$0x1] %vm517_vm0, %v514_v17 }
 0x177   : > { %532 = vrot.lane.b32.xlu1 %v512_v16, %s1480_s15  ;;  %524 = vrot.lane.b32.xlu0 %v512_v16, %s1481_s16 }
 0x17b   : > { %540 = vrot.lane.b32.xlu1 %v512_v16, %s1482_s17  ;;  %536 = vrot.lane.b32.xlu0 %v512_v16, %s1483_s18 }
 0x17f   : > { %544 = vrot.lane.b32.xlu0 %v512_v16, %s1484_s19  ;;  %550 = vrot.lane.b32.xlu1 %v514_v17, %s1479_s14  ;;  %s1486_s14 = smov [#allocation4]  }
 0x183   : > { %554 = vrot.lane.b32.xlu0 %v514_v17, %s1481_s16  ;;  %558 = vrot.lane.b32.xlu1 %v514_v17, %s1478_s13  ;;  %s1414_s13 = scalar_lea.vmem %s1845_s9, 2048 }
 0x184   : > { %p1415_p11 = scmp.ne.s32.totalorder %s1845_s9, %s1414_s13 }
 0x186   : > { %p1416_p12 = pnand %p1415_p11, %p1560_p5 }
 0x187   : > { %562 = vrot.lane.b32.xlu0 %v514_v17, %s1480_s15  ;;  %566 = vrot.lane.b32.xlu1 %v514_v17, %s1483_s18  ;;  %s1418_s15 = sshll.u32 %s1486_s14, 4  ;;  %s1419_s15 = int_to_ptr.vmem [resolvable:$false] %s1418_s15 }
 0x188   : > { %p1417_p13 = pneg %p1416_p12  ;;  %s1420_s16 = scalar_lea.vmem %s1419_s15, 4096 }
 0x189   : > { %p1421_p0 = scmp.lt.s32.totalorder %s1845_s9, %s1419_s15  ;;  %p1422_p1 = scmp.lt.s32.totalorder %s1420_s16, %s1414_s13 }
 0x18b   : > { %570 = vrot.lane.b32.xlu0 %v514_v17, %s1482_s17  ;;  %574 = vrot.lane.b32.xlu1 %v514_v17, %s1484_s19  ;;  %p1423_p2 = por %p1422_p1, %p1421_p0 }
 0x18d   : > { %p1424_p3 = pnand %p1423_p2, %p1417_p13 }
 0x18f   : > { %799 = vperm.xlu0 %1413, %v1110_v54  }
 0x1e5   : > { %v529_v19 = vpop.permute.xlu1 %528  ;;  %v521_v20 = vpop.permute.xlu0 %520 }
 0x1e6   : > { %531 = vst.msk [vmem:[#allocation2 + $0x3] sm:$0x1] %vm517_vm0, %v529_v19  ;;  %523 = vst.msk [vmem:[#allocation2 + $0x1] sm:$0x1] %vm517_vm0, %v521_v20 }
 0x1e9   : > { %v533_v21 = vpop.permute.xlu1 %532  ;;  %v525_v22 = vpop.permute.xlu0 %524 }
 0x1ea   : > { %535 = vst.msk [vmem:[#allocation2 + $0x4] sm:$0x1] %vm517_vm0, %v533_v21  ;;  %527 = vst.msk [vmem:[#allocation2 + $0x2] sm:$0x1] %vm517_vm0, %v525_v22 }
 0x1ed   : > { %v541_v23 = vpop.permute.xlu1 %540  ;;  %v537_v24 = vpop.permute.xlu0 %536 }
 0x1ee   : > { %543 = vst.msk [vmem:[#allocation2 + $0x6] sm:$0x1] %vm517_vm0, %v541_v23  ;;  %539 = vst.msk [vmem:[#allocation2 + $0x5] sm:$0x1] %vm517_vm0, %v537_v24 }
 0x1f1   : > { %v545_v25 = vpop.permute.xlu0 %544  ;;  %v551_v26 = vpop.permute.xlu1 %550 }
 0x1f2   : > { %547 = vst.msk [vmem:[#allocation2 + $0x7] sm:$0x1] %vm517_vm0, %v545_v25  ;;  %553 = vst.msk [vmem:[#allocation2 + $0x9] sm:$0x1] %vm517_vm0, %v551_v26 }
 0x1f5   : > { %v555_v27 = vpop.permute.xlu0 %554  ;;  %v559_v28 = vpop.permute.xlu1 %558 }
 0x1f6   : > { %557 = vst.msk [vmem:[#allocation2 + $0xa] sm:$0x1] %vm517_vm0, %v555_v27  ;;  %561 = vst.msk [vmem:[#allocation2 + $0xb] sm:$0x1] %vm517_vm0, %v559_v28 }
 0x1f9   : > { %v563_v29 = vpop.permute.xlu0 %562  ;;  %v567_v30 = vpop.permute.xlu1 %566  ;;  %v594_v35 = vld [vmem:[#allocation2] sm:$0xff] }
 0x1fa   : > { %565 = vst.msk [vmem:[#allocation2 + $0xc] sm:$0x1] %vm517_vm0, %v563_v29  ;;  %569 = vst.msk [vmem:[#allocation2 + $0xd] sm:$0x1] %vm517_vm0, %v567_v30 }
 0x1fd   : > { %v571_v31 = vpop.permute.xlu0 %570  ;;  %v575_v32 = vpop.permute.xlu1 %574 }
 0x1fe   : > { %573 = vst.msk [vmem:[#allocation2 + $0xe] sm:$0x1] %vm517_vm0, %v571_v31  ;;  %577 = vst.msk [vmem:[#allocation2 + $0xf] sm:$0x1] %vm517_vm0, %v575_v32 }
 0x205   : > { %v595_v36 = vld [vmem:[#allocation2 + $0x8] sm:$0xff] }
 0x206   : > { %v1354_v37 = vpack.c.bf16 %v595_v36, %v594_v35 }
 0x208   : > { %1355 = vmatprep.subr.bf16.mxu1 %v1354_v37 }
 0x209   : > { %1357 = vmatpush3.bf16.msra.mxu1 %v1354_v37 }
 0x20a   : > { %1359 = vmatprep.subr.bf16.mxu1 %v1358_v38 }
 0x20c   : > { %1175 = vmatmul.mubr.msk.f32.vlgmr.msra.gmra.mrb[0].mxu1 %vm596_vm1, %v579_v39 }
 0x20d   : > { %1177 = vmatprep.mubr.msk.f32.mxu1 %vm596_vm1, %v580_v40  ;;  %1361 = vmatpush3.bf16.msra.mxu1 %v1358_v38 }
 0x20e   : > { %v800_v6 = vpop.permute.xlu0 %799 }
 0x210   : > { %1178 = vmatmul.mubr.msk.f32.gmra.mrb[2].mxu1 %vm596_vm1, %v581_v41 }
 0x211   : > { %1180 = vmatprep.mubr.msk.f32.mxu1 %vm596_vm1, %v582_v42 }
 0x214   : > { %1181 = vmatmul.mubr.msk.f32.gmra.mrb[4].mxu1 %vm596_vm1, %v583_v43 }
 0x215   : > { %1183 = vmatprep.mubr.msk.f32.mxu1 %vm596_vm1, %v584_v44 }
 0x218   : > { %1184 = vmatmul.mubr.msk.f32.gmra.mrb[6].mxu1 %vm596_vm1, %v585_v45 }
 0x219   : > { %1186 = vmatprep.mubr.msk.f32.mxu1 %vm596_vm1, %v586_v46 }
 0x21c   : > { %1187 = vmatmul.mubr.msk.f32.gmra.mrb[8].mxu1 %vm596_vm1, %v587_v47 }
 0x21d   : > { %1189 = vmatprep.mubr.msk.f32.mxu1 %vm596_vm1, %v588_v48 }
 0x220   : > { %1190 = vmatmul.mubr.msk.f32.gmra.mrb[10].mxu1 %vm596_vm1, %v589_v49 }
 0x221   : > { %1192 = vmatprep.mubr.msk.f32.mxu1 %vm596_vm1, %v590_v50 }
 0x224   : > { %1193 = vmatmul.mubr.msk.f32.gmra.mrb[12].mxu1 %vm596_vm1, %v591_v51 }
 0x225   : > { %1195 = vmatprep.mubr.msk.f32.mxu1 %vm596_vm1, %v592_v52 }
 0x228   : > { %1196 = vmatmul.mubr.msk.f32.gmra.mrb[14].mxu1 %vm596_vm1, %v593_v53 }
 0x2df   : > { %v1176_v56 = vpop.f32.mrb[0].mxu1 }
 0x2e0   : > { %v711_v57 = vpop.f32.mrb[1].mxu1 }
 0x2e1   : > { %1202 = vmatprep.mubr.msk.f32.mxu1 %vm596_vm1, %v711_v57 }
 0x2e2   : > { %1203 = vmatmul.mubr.msk.f32.vlgmr.msra.gmra.mrb[16].mxu1 %vm596_vm1, %v1176_v56 }
 0x2e3   : > { %v1179_v58 = vpop.f32.mrb[2].mxu1 }
 0x2e4   : > { %v721_v59 = vpop.f32.mrb[3].mxu1 }
 0x2e5   : > { %1205 = vmatprep.mubr.msk.f32.mxu1 %vm596_vm1, %v721_v59 }
 0x2e6   : > { %1206 = vmatmul.mubr.msk.f32.gmra.mrb[18].mxu1 %vm596_vm1, %v1179_v58 }
 0x2e7   : > { %v1182_v60 = vpop.f32.mrb[4].mxu1 }
 0x2e8   : > { %v731_v61 = vpop.f32.mrb[5].mxu1 }
 0x2e9   : > { %1208 = vmatprep.mubr.msk.f32.mxu1 %vm596_vm1, %v731_v61 }
 0x2ea   : > { %1209 = vmatmul.mubr.msk.f32.gmra.mrb[20].mxu1 %vm596_vm1, %v1182_v60 }
 0x2eb   : > { %v1185_v62 = vpop.f32.mrb[6].mxu1 }
 0x2ec   : > { %v741_v63 = vpop.f32.mrb[7].mxu1 }
 0x2ed   : > { %1211 = vmatprep.mubr.msk.f32.mxu1 %vm596_vm1, %v741_v63 }
 0x2ee   : > { %1212 = vmatmul.mubr.msk.f32.gmra.mrb[22].mxu1 %vm596_vm1, %v1185_v62 }
 0x2ef   : > { %v1188_v0 = vpop.f32.mrb[8].mxu1 }
 0x2f0   : > { %v751_v1 = vpop.f32.mrb[9].mxu1 }
 0x2f1   : > { %1214 = vmatprep.mubr.msk.f32.mxu1 %vm596_vm1, %v751_v1 }
 0x2f2   : > { %1215 = vmatmul.mubr.msk.f32.gmra.mrb[24].mxu1 %vm596_vm1, %v1188_v0 }
 0x2f3   : > { %v1191_v2 = vpop.f32.mrb[10].mxu1 }
 0x2f4   : > { %v761_v12 = vpop.f32.mrb[11].mxu1 }
 0x2f5   : > { %1217 = vmatprep.mubr.msk.f32.mxu1 %vm596_vm1, %v761_v12 }
 0x2f6   : > { %1218 = vmatmul.mubr.msk.f32.gmra.mrb[26].mxu1 %vm596_vm1, %v1191_v2 }
 0x2f7   : > { %v1194_v3 = vpop.f32.mrb[12].mxu1 }
 0x2f8   : > { %v771_v4 = vpop.f32.mrb[13].mxu1 }
 0x2f9   : > { %1220 = vmatprep.mubr.msk.f32.mxu1 %vm596_vm1, %v771_v4 }
 0x2fa   : > { %1221 = vmatmul.mubr.msk.f32.gmra.mrb[28].mxu1 %vm596_vm1, %v1194_v3 }
 0x2fb   : > { %v1197_v5 = vpop.f32.mrb[14].mxu1 }
 0x2fc   : > { %v781_v13 = vpop.f32.mrb[15].mxu1 }
 0x2fd   : > { %1223 = vmatprep.mubr.msk.f32.mxu1 %vm596_vm1, %v781_v13 }
 0x2fe   : > { %1224 = vmatmul.mubr.msk.f32.gmra.mrb[30].mxu1 %vm596_vm1, %v1197_v5 }
 0x3b5   : > { %v1204_v7 = vpop.f32.mrb[16].mxu1 }
 0x3b6   : > { %v922_v8 = vadd.f32 %v1204_v7, %v800_v6  ;;  %v916_v9 = vpop.f32.mrb[17].mxu1 }
 0x3b7   : > { %v917_v10 = vadd.f32 %v916_v9, %v800_v6 }
 0x3b8   : > { %996 = vst [vmem:[%s1822_s7 + $0x8] sm:$0xff] %v922_v8 }
 0x3b9   : > { %995 = vst [vmem:[%s1822_s7] sm:$0xff] %v917_v10  ;;  %v1207_v11 = vpop.f32.mrb[18].mxu1 }
 0x3ba   : > { %v932_v14 = vadd.f32 %v1207_v11, %v800_v6  ;;  %v926_v15 = vpop.f32.mrb[19].mxu1 }
 0x3bb   : > { %v927_v16 = vadd.f32 %v926_v15, %v800_v6 }
 0x3bc   : > { %998 = vst [vmem:[%s1822_s7 + $0x18] sm:$0xff] %v932_v14 }
 0x3bd   : > { %997 = vst [vmem:[%s1822_s7 + $0x10] sm:$0xff] %v927_v16  ;;  %v1210_v17 = vpop.f32.mrb[20].mxu1 }
 0x3be   : > { %v942_v18 = vadd.f32 %v1210_v17, %v800_v6  ;;  %v936_v19 = vpop.f32.mrb[21].mxu1 }
 0x3bf   : > { %v937_v20 = vadd.f32 %v936_v19, %v800_v6 }
 0x3c0   : > { %1000 = vst [vmem:[%s1822_s7 + $0x28] sm:$0xff] %v942_v18 }
 0x3c1   : > { %999 = vst [vmem:[%s1822_s7 + $0x20] sm:$0xff] %v937_v20  ;;  %v1213_v21 = vpop.f32.mrb[22].mxu1 }
 0x3c2   : > { %v952_v22 = vadd.f32 %v1213_v21, %v800_v6  ;;  %v946_v23 = vpop.f32.mrb[23].mxu1 }
 0x3c3   : > { %v947_v24 = vadd.f32 %v946_v23, %v800_v6 }
 0x3c4   : > { %1002 = vst [vmem:[%s1822_s7 + $0x38] sm:$0xff] %v952_v22 }
 0x3c5   : > { %1001 = vst [vmem:[%s1822_s7 + $0x30] sm:$0xff] %v947_v24  ;;  %v1216_v25 = vpop.f32.mrb[24].mxu1 }
 0x3c6   : > { %v962_v26 = vadd.f32 %v1216_v25, %v800_v6  ;;  %v956_v27 = vpop.f32.mrb[25].mxu1 }
 0x3c7   : > { %v957_v28 = vadd.f32 %v956_v27, %v800_v6 }
 0x3c8   : > { %1004 = vst [vmem:[%s1822_s7 + $0x48] sm:$0xff] %v962_v26 }
 0x3c9   : > { %1003 = vst [vmem:[%s1822_s7 + $0x40] sm:$0xff] %v957_v28  ;;  %v1219_v29 = vpop.f32.mrb[26].mxu1 }
 0x3ca   : > { %v972_v30 = vadd.f32 %v1219_v29, %v800_v6  ;;  %v966_v31 = vpop.f32.mrb[27].mxu1 }
 0x3cb   : > { %v967_v32 = vadd.f32 %v966_v31, %v800_v6 }
 0x3cc   : > { %1006 = vst [vmem:[%s1822_s7 + $0x58] sm:$0xff] %v972_v30 }
 0x3cd   : > { %1005 = vst [vmem:[%s1822_s7 + $0x50] sm:$0xff] %v967_v32  ;;  %v1222_v33 = vpop.f32.mrb[28].mxu1 }
 0x3ce   : > { %v982_v34 = vadd.f32 %v1222_v33, %v800_v6  ;;  %v976_v35 = vpop.f32.mrb[29].mxu1 }
 0x3cf   : > { %v977_v36 = vadd.f32 %v976_v35, %v800_v6 }
 0x3d0   : > { %1008 = vst [vmem:[%s1822_s7 + $0x68] sm:$0xff] %v982_v34 }
 0x3d1   : > { %1007 = vst [vmem:[%s1822_s7 + $0x60] sm:$0xff] %v977_v36  ;;  %v1225_v37 = vpop.f32.mrb[30].mxu1 }
 0x3d2   : > { %v992_v38 = vadd.f32 %v1225_v37, %v800_v6  ;;  %v986_v39 = vpop.f32.mrb[31].mxu1 }
 0x3d3   : > { %v987_v40 = vadd.f32 %v986_v39, %v800_v6 }
 0x3d4   : > { %1010 = vst [vmem:[%s1822_s7 + $0x78] sm:$0xff] %v992_v38 }
 0x3d5   : > { %1009 = vst [vmem:[%s1822_s7 + $0x70] sm:$0xff] %v987_v40 }
 0x3d6   : > { %1427 = shalt.err (!%p1424_p3)
}
 0x3d7   : > { %s1428_s17 = scalar_lea.hbm %s1843_s12, 2048  ;;  %s1432_s24 = scalar_lea.hbm %s1897_s5, 4096 }
 0x3d8   : > { %p1429_p4 = scmp.ne.s32.totalorder %s1843_s12, %s1428_s17  ;;  %p1433_p9 = scmp.lt.u32.totalorder %s1843_s12, %s1897_s5 }
 0x3d9   : > { %p1434_p10 = scmp.lt.u32.totalorder %s1432_s24, %s1428_s17  ;;  %p1436_p12 = scmp.lt.u32.totalorder %s1428_s17, %s1843_s12 }
 0x3da   : > { %p1430_p7 = pnand %p1429_p4, %p1560_p5 }
 0x3db   : > { %p1435_p11 = por %p1434_p10, %p1433_p9 }
 0x3dc   : > { %p1431_p8 = pneg %p1430_p7 }
 0x3dd   : > { %p1437_p13 = por %p1436_p12, %p1435_p11 }
 0x3df   : > { %p1438_p0 = pnand %p1437_p13, %p1431_p8 }
 0x3e1   : > { %1441 = shalt.err (!%p1438_p0)
}
 0x3e2   : > { %s1487_s6 = smov 128   ;;  %s1488_s7 = smov 8  }
 0x3e3   : > { %1364 = dma.vmem_to_hbm [thread:$0]  (%p1560_p5), %s1845_s9, 2048, %s1843_s12, %s1851_s0, %s1487_s6, %s1487_s6, %s1488_s7  }
 0x3e4 PF: > { %p1370_p1 = scmp.ge.s32.totalorder %s1476_s23, 2  ;;  %s1040_s8 = sand.u32 1, %s1464_s20  }
 0x3e5   : > { %s1041_s10 = scalar_lea.sflag [#allocation5], %s1040_s8 }
 0x3e6   : > { %p1367_p2 = pnand %p1370_p1, %p1564_p6 }
 0x3e8   : > { %1459 = dma.done.wait (!%p1367_p2), %s1041_s10, 2048  }
 0x3e9   : > { %1461 = vsyncadd (!%p1367_p2), %s1041_s10, 4294965248  ;;  %p17_p3 = scmp.ge.s32.totalorder %s1547_s25, 4   ;;  %s1900_s20 = smov %s1468_s21 }
 0x3ea   : > { %s1901_s21 = smov %s1472_s22  ;;  %s1902_s22 = smov %s1558_s28 }
 0x3eb   : > { %s1903_s23 = smov %s1547_s25  ;;  %19 = sbr.rel (!%p17_p3) target bundleno = 6 (0x6), region = 75 }
 0x3f2   :  { %1046 = vsyncpa [#allocation5], 1 }
 0x3f3   :  { %1048 = vsyncpa [#allocation5 + $0x1], 1 }

</bundles_post_ra>
